<compile_context>
chip_gen: v7x
topology: tpu7x:2x2x1
jax: 0.10.0
libtpu: 0.0.40
codegen_flags: <defaults>
</compile_context>

<pallas_src>
import numpy as np
import jax
import jax.numpy as jnp
from jax import lax
from jax.experimental import pallas as pl
from jax.experimental.pallas import tpu as pltpu


_INV_2POW24 = np.float32(1.0 / (1 << 24))
_TWO_PI = np.float32(2.0 * np.pi)
_GOLDEN = 0x9E3779B1


def _lowbias32(x):
    """Avalanching uint32 hash (lowbias32) — pure VALU shift/xor/mul ops."""
    x = x ^ (x >> 16)
    x = x * jnp.uint32(0x7FEB352D)
    x = x ^ (x >> 15)
    x = x * jnp.uint32(0x846CA68B)
    x = x ^ (x >> 16)
    return x


def _bits_to_unit_open(bits):
    """uint32 bits -> float32 uniform in (0, 1]  (safe input for log)."""
    v = (bits >> 8).astype(jnp.int32).astype(jnp.float32)
    return (v + 1.0) * _INV_2POW24


def _bits_to_unit(bits):
    """uint32 bits -> float32 uniform in [0, 1)."""
    v = (bits >> 8).astype(jnp.int32).astype(jnp.float32)
    return v * _INV_2POW24


def _make_noise_kernel(*, total_rows, tile_rows, scale, lo, hi, sparsity, manifold):
    scale = np.float32(scale)
    lo = np.float32(lo)
    hi = np.float32(hi)
    sparsity = float(sparsity)
    manifold = bool(manifold)

    half = tile_rows // 2
    paired = (tile_rows % 2 == 0) and half > 0
    tile_elems = tile_rows * 128
    total_elems = total_rows * 128
    # Disjoint counter ranges for the (optional) sparsity stream.
    spars_offset = total_elems if paired else 2 * total_elems

    def kernel(seed_ref, x_ref, o_ref):
        mb = pl.program_id(0)
        rt = pl.program_id(1)

        # Per-minibatch key (matches the per-minibatch sampling in the
        # reference loop).  Counters are global within the minibatch, so the
        # noise does not depend on the row-tile size.
        key = seed_ref[mb].astype(jnp.uint32) * jnp.uint32(_GOLDEN)

        if paired:
            shape = (half, 128)
            row = lax.broadcasted_iota(jnp.int32, shape, 0)
            col = lax.broadcasted_iota(jnp.int32, shape, 1)
            pair_idx = (rt * (half * 128) + row * 128 + col).astype(jnp.uint32)
            draw0 = key + pair_idx * jnp.uint32(2)
            u1 = _bits_to_unit_open(_lowbias32(draw0))
            u2 = _bits_to_unit(_lowbias32(draw0 + jnp.uint32(1)))
            # Box-Muller with cos/sin pairing: two normals per uniform pair.
            r = jnp.sqrt(jnp.float32(-2.0) * jnp.log(u1))
            theta = _TWO_PI * u2
            z = jnp.concatenate([r * jnp.cos(theta), r * jnp.sin(theta)], axis=0)
        else:
            # Fallback when the tile has an odd number of rows.
            shape = (tile_rows, 128)
            row = lax.broadcasted_iota(jnp.int32, shape, 0)
            col = lax.broadcasted_iota(jnp.int32, shape, 1)
            idx = (rt * tile_elems + row * 128 + col).astype(jnp.uint32)
            draw0 = key + idx * jnp.uint32(2)
            u1 = _bits_to_unit_open(_lowbias32(draw0))
            u2 = _bits_to_unit(_lowbias32(draw0 + jnp.uint32(1)))
            z = jnp.sqrt(jnp.float32(-2.0) * jnp.log(u1)) * jnp.cos(_TWO_PI * u2)

        noise = scale * z  # scale = epsilon / std, folded at trace time

        if sparsity > 0.0:
            erow = lax.broadcasted_iota(jnp.int32, (tile_rows, 128), 0)
            ecol = lax.broadcasted_iota(jnp.int32, (tile_rows, 128), 1)
            elem_idx = (rt * tile_elems + erow * 128 + ecol).astype(jnp.uint32)
            u3 = _bits_to_unit(
                _lowbias32(key + jnp.uint32(spars_offset) + elem_idx))
            noise = jnp.where(u3 < np.float32(sparsity), jnp.float32(0.0), noise)

        out = x_ref[...] + noise
        if not manifold:
            out = jnp.clip(out, lo, hi)
        o_ref[...] = out.astype(o_ref.dtype)

    return kernel


def _pick_row_tile(rows, max_rows=1024):
    """Largest row tile <= max_rows that is a multiple of 8 and divides rows."""
    if rows <= max_rows:
        return rows          # full extent: always a legal block shape
    start = max_rows - (max_rows % 8)
    for tr in range(start, 7, -8):
        if rows % tr == 0:
            return tr
    return rows  # no nice divisor: fall back to whole-minibatch blocks


def noise_sampler_forward(batch, seeds, *, minibatchsize, epsilon=0.1,
                          mean=0.5, std=0.5, sparsity=0.0, manifold=False,
                          max_tile_rows=1024, donate_input=False):
    """batch: NCHW float32 [B, C, H, W]; seeds: int32 [B // minibatchsize]."""
    B, C, H, W = batch.shape
    assert B % minibatchsize == 0
    num_mb = B // minibatchsize
    D = minibatchsize * C * H * W
    assert D % 128 == 0, "per-minibatch element count must be a multiple of 128"
    rows = D // 128
    tile_rows = _pick_row_tile(rows, max_tile_rows)
    num_tiles = rows // tile_rows

    x = batch.astype(jnp.float32).reshape(num_mb, rows, 128)
    seeds = seeds.astype(jnp.int32)

    scale = float(epsilon) / float(std)
    lo = (0.0 - float(mean)) / float(std)
    hi = (1.0 - float(mean)) / float(std)

    kernel = _make_noise_kernel(
        total_rows=rows, tile_rows=tile_rows, scale=scale, lo=lo, hi=hi,
        sparsity=float(sparsity), manifold=bool(manifold))

    out = pl.pallas_call(
        kernel,
        out_shape=jax.ShapeDtypeStruct((num_mb, rows, 128), jnp.float32),
        grid_spec=pltpu.PrefetchScalarGridSpec(
            num_scalar_prefetch=1,                       # seeds -> SMEM
            grid=(num_mb, num_tiles),
            in_specs=[pl.BlockSpec((None, tile_rows, 128),
                                   lambda mb, rt, seeds: (mb, rt, 0))],
            out_specs=pl.BlockSpec((None, tile_rows, 128),
                                   lambda mb, rt, seeds: (mb, rt, 0)),
        ),
        compiler_params=pltpu.CompilerParams(
            # Stateless counter-based RNG => every grid step is independent;
            # "parallel" lets v7x shard the grid across its 2 TensorCores.
            dimension_semantics=("parallel", "parallel"),
        ),
        # Elementwise in-place update (saves one full HBM buffer) — enable
        # only when the caller does not reuse the normalized input batch.
        input_output_aliases=({1: 0} if donate_input else {}),
    )(seeds, x)

    return out.reshape(B, C, H, W)


# TODO(synk): the 'uniform-l0-impulse' branch (random flat-index scatter mask)
# and the Python-level random.sample over corruption types have no clean
# in-kernel equivalent; only the gaussian / dense elementwise corruption path
# is implemented (the noise type is a trace-time choice).


if __name__ == "__main__":
    key = jax.random.PRNGKey(0)
    k_batch, _ = jax.random.split(key)

    # Small shapes consistent with the module: NCHW image batch.
    B, C, H, W = 4, 4, 16, 16
    minibatchsize = 2
    mean, std = 0.5, 0.5

    batch = jax.random.uniform(k_batch, (B, C, H, W), dtype=jnp.float32)
    # Normalize like the reference (mean/std) so the clamp bounds are meaningful.
    batch_norm = (batch - mean) / std

    seeds = jnp.arange(B // minibatchsize, dtype=jnp.int32) + 12345

    out = noise_sampler_forward(
        batch_norm, seeds,
        minibatchsize=minibatchsize,
        epsilon=0.1, mean=mean, std=std, sparsity=0.0, manifold=False,
    )
    out = jax.block_until_ready(out)

    assert out.shape == (B, C, H, W)
    assert bool(jnp.all(jnp.isfinite(out)))
    lo, hi = (0.0 - mean) / std, (1.0 - mean) / std
    assert bool(jnp.all(out >= lo - 1e-5)) and bool(jnp.all(out <= hi + 1e-5))
    # Noise actually applied, with roughly the right magnitude (epsilon/std = 0.2,
    # loosely bounded since clamping truncates the tails).
    diff_std = float(jnp.std(out - batch_norm))
    assert 0.05 < diff_std < 0.5, diff_std
    print("KERNEL_OK")
</pallas_src>

<mosaic_0001>
module attributes {stable_mosaic.version = 11 : i64} {
  func.func @kernel(%arg0: i32, %arg1: i32, %arg2: memref<2xi32, #tpu.memory_space<smem>>, %arg3: memref<1x16x128xf32, #tpu.memory_space<vmem>>, %arg4: memref<1x16x128xf32, #tpu.memory_space<vmem>>) attributes {dimension_semantics = [#tpu.dimension_semantics<parallel>, #tpu.dimension_semantics<parallel>], iteration_bounds = array<i64: 2, 1>, scalar_prefetch = 1 : i64, scratch_operands = 0 : i64, tpu.core_type = #tpu.core_type<tc>, window_params = [{transform_indices = @transform_0, window_bounds = array<i64: 1, 16, 128>}, {transform_indices = @transform_1, window_bounds = array<i64: 1, 16, 128>}]} {
    %0 = arith.index_cast %arg0 : i32 to index
    %1 = memref.load %arg2[%0] : memref<2xi32, #tpu.memory_space<smem>>
    %c-1640531535_i32 = arith.constant -1640531535 : i32
    %2 = arith.muli %1, %c-1640531535_i32 : i32
    %3 = tpu.iota {dimensions = array<i32: 0>} : vector<8x128xi32>
    %4 = tpu.iota {dimensions = array<i32: 1>} : vector<8x128xi32>
    %c1024_i32 = arith.constant 1024 : i32
    %5 = arith.muli %arg1, %c1024_i32 : i32
    %c128_i32 = arith.constant 128 : i32
    %6 = vector.broadcast %c128_i32 : i32 to vector<8x128xi32>
    %7 = arith.muli %3, %6 : vector<8x128xi32>
    %8 = vector.broadcast %5 : i32 to vector<8x128xi32>
    %9 = arith.addi %8, %7 : vector<8x128xi32>
    %10 = arith.addi %9, %4 : vector<8x128xi32>
    %c2_i32 = arith.constant 2 : i32
    %11 = vector.broadcast %c2_i32 : i32 to vector<8x128xi32>
    %12 = arith.muli %10, %11 : vector<8x128xi32>
    %13 = vector.broadcast %2 : i32 to vector<8x128xi32>
    %14 = arith.addi %13, %12 : vector<8x128xi32>
    %c16_i32 = arith.constant 16 : i32
    %15 = vector.broadcast %c16_i32 : i32 to vector<8x128xi32>
    %16 = arith.shrui %14, %15 : vector<8x128xi32>
    %17 = arith.xori %14, %16 : vector<8x128xi32>
    %c2146121005_i32 = arith.constant 2146121005 : i32
    %18 = vector.broadcast %c2146121005_i32 : i32 to vector<8x128xi32>
    %19 = arith.muli %17, %18 : vector<8x128xi32>
    %c15_i32 = arith.constant 15 : i32
    %20 = vector.broadcast %c15_i32 : i32 to vector<8x128xi32>
    %21 = arith.shrui %19, %20 : vector<8x128xi32>
    %22 = arith.xori %19, %21 : vector<8x128xi32>
    %c-2073254261_i32 = arith.constant -2073254261 : i32
    %23 = vector.broadcast %c-2073254261_i32 : i32 to vector<8x128xi32>
    %24 = arith.muli %22, %23 : vector<8x128xi32>
    %c16_i32_0 = arith.constant 16 : i32
    %25 = vector.broadcast %c16_i32_0 : i32 to vector<8x128xi32>
    %26 = arith.shrui %24, %25 : vector<8x128xi32>
    %27 = arith.xori %24, %26 : vector<8x128xi32>
    %c8_i32 = arith.constant 8 : i32
    %28 = vector.broadcast %c8_i32 : i32 to vector<8x128xi32>
    %29 = arith.shrui %27, %28 : vector<8x128xi32>
    %30 = arith.sitofp %29 : vector<8x128xi32> to vector<8x128xf32>
    %cst = arith.constant 1.000000e+00 : f32
    %31 = vector.broadcast %cst : f32 to vector<8x128xf32>
    %32 = arith.addf %30, %31 : vector<8x128xf32>
    %cst_1 = arith.constant 5.96046448E-8 : f32
    %33 = vector.broadcast %cst_1 : f32 to vector<8x128xf32>
    %34 = arith.mulf %32, %33 : vector<8x128xf32>
    %c1_i32 = arith.constant 1 : i32
    %35 = vector.broadcast %c1_i32 : i32 to vector<8x128xi32>
    %36 = arith.addi %14, %35 : vector<8x128xi32>
    %c16_i32_2 = arith.constant 16 : i32
    %37 = vector.broadcast %c16_i32_2 : i32 to vector<8x128xi32>
    %38 = arith.shrui %36, %37 : vector<8x128xi32>
    %39 = arith.xori %36, %38 : vector<8x128xi32>
    %c2146121005_i32_3 = arith.constant 2146121005 : i32
    %40 = vector.broadcast %c2146121005_i32_3 : i32 to vector<8x128xi32>
    %41 = arith.muli %39, %40 : vector<8x128xi32>
    %c15_i32_4 = arith.constant 15 : i32
    %42 = vector.broadcast %c15_i32_4 : i32 to vector<8x128xi32>
    %43 = arith.shrui %41, %42 : vector<8x128xi32>
    %44 = arith.xori %41, %43 : vector<8x128xi32>
    %c-2073254261_i32_5 = arith.constant -2073254261 : i32
    %45 = vector.broadcast %c-2073254261_i32_5 : i32 to vector<8x128xi32>
    %46 = arith.muli %44, %45 : vector<8x128xi32>
    %c16_i32_6 = arith.constant 16 : i32
    %47 = vector.broadcast %c16_i32_6 : i32 to vector<8x128xi32>
    %48 = arith.shrui %46, %47 : vector<8x128xi32>
    %49 = arith.xori %46, %48 : vector<8x128xi32>
    %c8_i32_7 = arith.constant 8 : i32
    %50 = vector.broadcast %c8_i32_7 : i32 to vector<8x128xi32>
    %51 = arith.shrui %49, %50 : vector<8x128xi32>
    %52 = arith.sitofp %51 : vector<8x128xi32> to vector<8x128xf32>
    %cst_8 = arith.constant 5.96046448E-8 : f32
    %53 = vector.broadcast %cst_8 : f32 to vector<8x128xf32>
    %54 = arith.mulf %52, %53 : vector<8x128xf32>
    %55 = math.log %34 : vector<8x128xf32>
    %cst_9 = arith.constant -2.000000e+00 : f32
    %56 = vector.broadcast %cst_9 : f32 to vector<8x128xf32>
    %57 = arith.mulf %56, %55 : vector<8x128xf32>
    %58 = math.sqrt %57 : vector<8x128xf32>
    %cst_10 = arith.constant 6.28318548 : f32
    %59 = vector.broadcast %cst_10 : f32 to vector<8x128xf32>
    %60 = arith.mulf %59, %54 : vector<8x128xf32>
    %61 = math.cos %60 : vector<8x128xf32>
    %62 = arith.mulf %58, %61 : vector<8x128xf32>
    %63 = math.sin %60 : vector<8x128xf32>
    %64 = arith.mulf %58, %63 : vector<8x128xf32>
    %65 = tpu.concatenate %62, %64 in 0 : vector<8x128xf32>, vector<8x128xf32> -> vector<16x128xf32>
    %cst_11 = arith.constant 2.000000e-01 : f32
    %66 = vector.broadcast %cst_11 : f32 to vector<16x128xf32>
    %67 = arith.mulf %66, %65 : vector<16x128xf32>
    %c0 = arith.constant 0 : index
    %c0_12 = arith.constant 0 : index
    %c0_13 = arith.constant 0 : index
    %68 = vector.load %arg3[%c0, %c0_12, %c0_13] : memref<1x16x128xf32, #tpu.memory_space<vmem>>, vector<1x16x128xf32>
    %69 = vector.shape_cast %68 : vector<1x16x128xf32> to vector<16x128xf32>
    %70 = arith.addf %69, %67 : vector<16x128xf32>
    %cst_14 = arith.constant -1.000000e+00 : f32
    %cst_15 = arith.constant 1.000000e+00 : f32
    %71 = vector.broadcast %cst_14 : f32 to vector<16x128xf32>
    %72 = arith.maximumf %71, %70 : vector<16x128xf32>
    %73 = vector.broadcast %cst_15 : f32 to vector<16x128xf32>
    %74 = arith.minimumf %73, %72 : vector<16x128xf32>
    %c0_16 = arith.constant 0 : index
    %c0_17 = arith.constant 0 : index
    %c0_18 = arith.constant 0 : index
    %75 = vector.load %arg4[%c0_16, %c0_17, %c0_18] : memref<1x16x128xf32, #tpu.memory_space<vmem>>, vector<1x16x128xf32>
    %76 = vector.shape_cast %75 : vector<1x16x128xf32> to vector<16x128xf32>
    %77 = vector.shape_cast %74 : vector<16x128xf32> to vector<1x16x128xf32>
    tpu.vector_store %arg4[%c0_16, %c0_17, %c0_18], %77 {strides = array<i32>} : memref<1x16x128xf32, #tpu.memory_space<vmem>>, vector<1x16x128xf32>,
    return
  }
  func.func @transform_0(%arg0: i32, %arg1: i32, %arg2: memref<2xi32, #tpu.memory_space<smem>>) -> (i32, i32, i32) {
    %c0_i32 = arith.constant 0 : i32
    %c0_i32_0 = arith.constant 0 : i32
    return %arg0, %arg1, %c0_i32 : i32, i32, i32
  }
  func.func @transform_1(%arg0: i32, %arg1: i32, %arg2: memref<2xi32, #tpu.memory_space<smem>>) -> (i32, i32, i32) {
    %c0_i32 = arith.constant 0 : i32
    %c0_i32_0 = arith.constant 0 : i32
    return %arg0, %arg1, %c0_i32 : i32, i32, i32
  }
}

</mosaic_0001>

<bundles_post_ra>
// kernel: tpu_custom_call.1
= control target key start
LH: loop header
LB: loop body
LE: loop exit
PB: predicated region body
PF: predicated region fallthrough
CT: control target
= control target key end

     0   :  { %s1016_s0 = inlined_call_operand.hbm [shape: s32[2], index: 0, kind: input, shape index: {}]   ;;  %s1017_s1 = inlined_call_operand.hbm [shape: f32[2,16,128], index: 1, kind: input, shape index: {}]   ;;  %s1018_s2 = inlined_call_operand.hbm [shape: f32[2,16,128], index: 2, kind: output, shape index: {}]  }
   0x1   :  { %s645_s11 = scalar_lea.hbm %s1016_s0, 16 }
   0x2   :  { %p646_p0 = scmp.ne.s32.totalorder %s1016_s0, %s645_s11  ;;  %p649_p1 = scmp.lt.u32.totalorder %s645_s11, %s1016_s0 }
   0x4   :  { %p651_p2 = pnand %p649_p1, %p646_p0 }
   0x6   :  { %654 = shalt.err (!%p651_p2)  }
   0x7   :  { %s771_s16 = smov [#allocation3]  }
   0x8   :  { %8 = dma.hbm_to_smem %s1016_s0, 16, %s771_s16, [#allocation2] }
   0x9   :  { %737 = dma.done.wait [#allocation2], 16 }
   0xa   :  { %738 = vsyncadd [#allocation2], 4294967280 }
   0xb   :  { %10 = sfence }
   0xc   :  { %11 = vsyncpa [#allocation5], 0 }
   0xd   :  { %13 = vsyncpa [#allocation5 + $0x1], 0 }
   0xe   :  { %14 = vsyncpa [#allocation6], 0 }
   0xf   :  { %16 = vsyncpa [#allocation6 + $0x1], 0  ;;  %s811_s19 = smov 0   ;;  %s813_s20 = smov 0  }
  0x10   :  { %s815_s21 = smov 0   ;;  %s817_s22 = smov 0  }
  0x11   :  { %s819_s23 = smov 0   ;;  %s821_s24 = smov 0  }
  0x12 LB: > { %s533_s0 = sadd.s32 4294967295, %s769_s24   ;;  %s534_s25 = sadd.s32 4294967294, %s769_s24   ;;  %s769_s24 = sphi %s821_s24, %s22_s24   ;;  %s765_s23 = sphi %s819_s23, %s1033_s23   ;;  %s761_s22 = sphi %s817_s22, %s1032_s22   ;;  %s757_s21 = sphi %s815_s21, %s1031_s21   ;;  %s753_s20 = sphi %s813_s20, %s1030_s20   ;;  %s749_s19 = sphi %s811_s19, %s1029_s19  }
  0x13   : > { %s34_s26 = sadd.s32 1, %s765_s23  ;;  %s43_s27 = sadd.s32 1, %s757_s21 }
  0x14   : > { %p36_p3 = scmp.ge.s32.totalorder %s34_s26, 2  ;;  %p50_p4 = scmp.ne.s32.totalorder %s757_s21, %s753_s20 }
  0x15   : > { %p51_p5 = scmp.eq.s32.totalorder %s769_s24, 0  ;;  %p56_p6 = scmp.ne.s32.totalorder %s753_s20, %s749_s19 }
  0x16   : > { %s1035_s26 = smov (%p36_p3, %s34_s26), 0  ;;  %p57_p8 = scmp.eq.s32.totalorder %s533_s0, 0 }
  0x17   : > { %p852_p7 = por %p51_p5, %p50_p4  ;;  %s38_s29 = ssub.s32 %s765_s23, %s1035_s26 }
  0x18   : > { %p82_p9 = scmp.eq.s32.totalorder %s533_s0, 1  ;;  %p41_p10 = scmp.eq.s32.totalorder %s38_s29, 0 }
  0x19   : > { %p858_p11 = por %p57_p8, %p56_p6  ;;  %p88_p13 = scmp.eq.s32.totalorder %s534_s25, 1 }
  0x1a   : > { %p862_p12 = por %p82_p9, %p50_p4  ;;  %p576_p2 = scmp.lt.s32.totalorder %s769_s24, 2 }
  0x1b   : > { %s867_s4 = scalar_select %p41_p10, %s757_s21, %s43_s27  }
  0x1c   : > { %s1022_s3 = scalar_select %p862_p12, 1, 0 }
  0x1d   : > { %p869_p0 = por %p88_p13, %p56_p6  ;;  %s108_s6 = sand.u32 1, %s757_s21  }
  0x1e   : > { %s537_s7 = sshll.u32 %s108_s6, 4  ;;  %s558_s8 = sshll.u32 %s765_s23, 8 }
  0x1f   : > { %s1023_s5 = scalar_select %p869_p0, 1, 0 }
  0x20   : > { %s880_s11 = scalar_lea.hbm %s1017_s1, %s558_s8  ;;  %s112_s12 = scalar_lea.vmem [#allocation4], %s537_s7 }
  0x21   : > { %s121_s13 = sshll.u32 %s112_s12, 4  ;;  %p886_p3 = pnand %p576_p2, %p852_p7  ;;  %s882_s13 = int_to_ptr.vmem [resolvable:$true] %s121_s13 }
  0x22   : > { %s891_s15 = scalar_lea.sflag [#allocation5], %s108_s6  ;;  %s655_s16 = scalar_lea.hbm %s880_s11, 256 }
  0x23   : > { %p656_p5 = scmp.ne.s32.totalorder %s880_s11, %s655_s16  ;;  %p657_p6 = pneg %p886_p3 }
  0x24   : > { %s660_s0 = scalar_lea.hbm %s1017_s1, 512  ;;  %p661_p7 = scmp.lt.u32.totalorder %s880_s11, %s1017_s1 }
  0x25   : > { %p658_p8 = pnand %p657_p6, %p656_p5  ;;  %p662_p10 = scmp.lt.u32.totalorder %s660_s0, %s655_s16 }
  0x26   : > { %p664_p2 = scmp.lt.u32.totalorder %s655_s16, %s880_s11 }
  0x27   : > { %p659_p9 = pneg %p658_p8  ;;  %p663_p13 = por %p662_p10, %p661_p7 }
  0x29   : > { %p665_p1 = por %p664_p2, %p663_p13 }
  0x2b   : > { %p666_p4 = pnand %p665_p1, %p659_p9 }
  0x2d   : > { %669 = shalt.err (!%p666_p4)
}
  0x2e   : > { %s670_s28 = scalar_lea.vmem %s882_s13, 256  ;;  %s772_s29 = smov [#allocation4]  }
  0x2f   : > { %p671_p5 = scmp.ne.s32.totalorder %s882_s13, %s670_s28  ;;  %s675_s6 = sshll.u32 %s772_s29, 4  ;;  %s676_s6 = int_to_ptr.vmem [resolvable:$false] %s675_s6 }
  0x30   : > { %s677_s7 = scalar_lea.vmem %s676_s6, 512  ;;  %p678_p12 = scmp.lt.s32.totalorder %s882_s13, %s676_s6 }
  0x31   : > { %p673_p8 = pnand %p671_p5, %p657_p6  ;;  %p679_p7 = scmp.lt.s32.totalorder %s677_s7, %s670_s28 }
  0x33   : > { %p674_p0 = pneg %p673_p8  ;;  %p680_p10 = por %p679_p7, %p678_p12 }
  0x35   : > { %p681_p13 = pnand %p680_p10, %p674_p0 }
  0x37   : > { %684 = shalt.err (!%p681_p13)
}
  0x38   : > { %s773_s8 = smov 128   ;;  %s774_s9 = smov 8  }
  0x39   : > { %571 = dma.hbm_to_vmem [thread:$0]  (!%p886_p3), %s880_s11, 256, %s882_s13, %s891_s15, %s773_s8, %s773_s8, %s774_s9  }
  0x3a   : > { %p129_p1 = scmp.lt.s32.totalorder %s769_s24, 3  ;;  %p1025_p4 = scmp.ge.s32.totalorder %s769_s24, 1 }
  0x3c   : > { %p130_p6 = pnand %p1025_p4, %p129_p1 }
  0x3d   : > { %s923_s10 = sand.u32 (!%p130_p6), 1, %s753_s20  }
  0x3e   : > { %133 = sbr.rel (%p130_p6) target bundleno = 211 (0xd3), region = 24  ;;  %s541_s12 = sshll.u32 (!%p130_p6), %s923_s10, 4 }
  0x3f   : > { %s136_s16 = scalar_lea.sflag (!%p130_p6), [#allocation5], %s923_s10  ;;  %s929_s17 = scalar_lea.vmem (!%p130_p6), [#allocation4], %s541_s12 }
  0x45   : > { %740 = dma.done.wait (%p858_p11), %s136_s16, 256  }
  0x46   : > { %742 = vsyncadd (%p858_p11), %s136_s16, 4294967040  ;;  %v162_v0 = vlaneseq  ;;  %s160_s11 = sld [smem:[#allocation3 + %s761_s22]]  ;;  %v775_v39 = vmov 683565275   ;;  %v776_v41 = vmov 2475754826  }
  0x47   : > { %v777_v43 = vmov 2131351028   ;;  %v778_v50 = vmov 2102212464   ;;  %v779_v53 = vmov 920167782  }
  0x48   : > { %v163_v1 = vshrl.u32 %v162_v0, 7  ;;  %v165_v2 = vand.u32 127, %v162_v0  ;;  %v780_v56 = vmov 1326507024   ;;  %s157_s30 = scalar_lea.vmem [#allocation7], %s541_s12  ;;  %s559_s15 = sshll.u32 %s761_s22, 8 }
  0x49   : > { %s446_s14 = sshll.u32 %s157_s30, 4  ;;  %s967_s25 = scalar_lea.hbm %s1018_s2, %s559_s15  ;;  %s962_s14 = int_to_ptr.vmem [resolvable:$true] %s446_s14 }
  0x4a   : > { %v167_v3 = vmul.u32 128, %v163_v1  ;;  %s431_s27 = scalar_lea.sflag [#allocation6], %s923_s10  ;;  %s685_s28 = scalar_lea.vmem %s962_s14, 256 }
  0x4b   : > { %p686_p11 = scmp.ne.s32.totalorder %s962_s14, %s685_s28  ;;  %p1026_p12 = scmp.ne.s32.totalorder %s1022_s3, 0 }
  0x4c   : > { %v170_v4 = vadd.s32 %v167_v3, %v165_v2  ;;  %s161_s13 = smul.u32 2654435761, %s160_s11  ;;  %s781_s22 = smov [#allocation7]  }
  0x4d   : > { %p687_p0 = pnand %p686_p11, %p1026_p12  ;;  %s689_s29 = sshll.u32 %s781_s22, 4  ;;  %s690_s29 = int_to_ptr.vmem [resolvable:$false] %s689_s29 }
  0x4e   : > { %v171_v5 = vmul.u32 2, %v170_v4  ;;  %v172_v6 = vstv %s161_s13  ;;  %s691_s6 = scalar_lea.vmem %s690_s29, 512  ;;  %p692_p9 = scmp.lt.s32.totalorder %s962_s14, %s690_s29 }
  0x4f   : > { %p688_p3 = pneg %p687_p0  ;;  %p693_p2 = scmp.lt.s32.totalorder %s691_s6, %s685_s28 }
  0x50   : > { %v173_v7 = vadd.s32 %v172_v6, %v171_v5 }
  0x51   : > { %p694_p5 = por %p693_p2, %p692_p9 }
  0x52   : > { %v186_v8 = vadd.s32 1, %v173_v7  ;;  %v174_v14 = vshrl.u32 %v173_v7, 16 }
  0x53   : > { %p695_p8 = pnand %p694_p5, %p688_p3 }
  0x54   : > { %v187_v9 = vshrl.u32 %v186_v8, 16  ;;  %v175_v17 = vxor.u32 %v174_v14, %v173_v7 }
  0x56   : > { %v188_v10 = vxor.u32 %v187_v9, %v186_v8  ;;  %v176_v20 = vmul.u32 2146121005, %v175_v17 }
  0x58   : > { %v189_v11 = vmul.u32 2146121005, %v188_v10  ;;  %v177_v23 = vshrl.u32 %v176_v20, 15 }
  0x5a   : > { %v190_v12 = vshrl.u32 %v189_v11, 15  ;;  %v178_v26 = vxor.u32 %v177_v23, %v176_v20 }
  0x5c   : > { %v191_v13 = vxor.u32 %v190_v12, %v189_v11  ;;  %v179_v30 = vmul.u32 2221713035, %v178_v26 }
  0x5e   : > { %v192_v15 = vmul.u32 2221713035, %v191_v13  ;;  %v180_v33 = vshrl.u32 %v179_v30, 16 }
  0x60   : > { %v193_v16 = vshrl.u32 %v192_v15, 16  ;;  %v181_v45 = vxor.u32 %v180_v33, %v179_v30 }
  0x62   : > { %v194_v18 = vxor.u32 %v193_v16, %v192_v15  ;;  %v182_v8 = vshrl.u32 %v181_v45, 8 }
  0x64   : > { %v195_v19 = vshrl.u32 %v194_v18, 8  ;;  %v183_v17 = vcvt.s32.f32 %v182_v8 }
  0x66   : > { %v196_v21 = vcvt.s32.f32 %v195_v19 }
  0x68   : > { %v197_v22 = vmul.f32 5.9604645e-08, %v196_v21  ;;  %v184_v21 = vadd.f32 1.0, %v183_v17 }
  0x6a   : > { %v936_v24 = vmul.f32 6.2831855, %v197_v22 }
  0x6c   : > { %v212_v25 = vand.u32 2139095040, %v936_v24  ;;  %v209_v27 = vand.u32 2147483647, %v936_v24  ;;  %vm211_vm7 = vcmp.lt.s32.totalorder %v936_v24, 0 }
  0x6e   : > { %v213_v28 = vshrl.u32 %v212_v25, 23  ;;  %v216_v31 = vand.u32 8388607, %v209_v27  ;;  %v185_v25 = vmul.f32 5.9604645e-08, %v184_v21  ;;  %vm210_vm8 = vcmp.le.f32.partialorder %v209_v27, 0.7853982 }
  0x70   : > { %v543_v29 = vadd.s32 4294967169, %v213_v28  ;;  %v217_v34 = vor.u32 8388608, %v216_v31  ;;  %637 = vlog2.f32 %v185_v25 }
  0x72   : > { %v219_v32 = vadd.s32 1, %v543_v29  ;;  %v257_v46 = vshll.u32 %v217_v34, 8 }
  0x74   : > { %vm220_vm0 = vcmp.gt.s32.totalorder %v219_v32, 0 }
  0x75   : > { %v221_v35 = vsel %vm220_vm0, %v219_v32, 0 }
  0x76   : > { %v223_v36 = vand.u32 31, %v221_v35  ;;  %v222_v37 = vshrl.u32 %v221_v35, 5 }
  0x78   : > { %v224_v38 = vsub.s32 32, %v223_v36  ;;  %v226_v40 = vshll.u32 %v775_v39, %v223_v36  ;;  %v229_v42 = vshll.u32 %v776_v41, %v223_v36  ;;  %v232_v44 = vshll.u32 %v777_v43, %v223_v36 }
  0x79   : > { %v235_v52 = vshll.u32 %v778_v50, %v223_v36  ;;  %v238_v55 = vshll.u32 %v779_v53, %v223_v36  ;;  %vm241_vm1 = vcmp.lt.s32.totalorder %v222_v37, 1  ;;  %vm242_vm2 = vcmp.lt.s32.totalorder %v222_v37, 2 }
  0x7a   : > { %v225_v47 = vshrl.u32 %v775_v39, %v224_v38  ;;  %v227_v48 = vshrl.u32 %v776_v41, %v224_v38  ;;  %v230_v49 = vshrl.u32 %v777_v43, %v224_v38  ;;  %v233_v51 = vshrl.u32 %v778_v50, %v224_v38  ;;  %v638_v34 = vpop.eup %637 }
  0x7b   : > { %v236_v54 = vshrl.u32 %v779_v53, %v224_v38  ;;  %v239_v57 = vshrl.u32 %v780_v56, %v224_v38  ;;  %vm243_vm3 = vcmp.lt.s32.totalorder %v222_v37, 3  ;;  %vm244_vm4 = vcmp.lt.s32.totalorder %v222_v37, 4 }
  0x7c   : > { %v228_v58 = vor.u32 %v227_v48, %v226_v40  ;;  %v231_v59 = vor.u32 %v230_v49, %v229_v42  ;;  %v234_v60 = vor.u32 %v233_v51, %v232_v44  ;;  %v199_v39 = vmul.f32 0.6931472, %v638_v34 }
  0x7d   : > { %v237_v61 = vor.u32 %v236_v54, %v235_v52  ;;  %v240_v62 = vor.u32 %v239_v57, %v238_v55 }
  0x7e   : > { %v245_v63 = vsel %vm241_vm1, %v225_v47, %v228_v58  ;;  %v249_v0 = vsel %vm241_vm1, %v228_v58, %v231_v59  ;;  %v253_v1 = vsel %vm241_vm1, %v231_v59, %v234_v60  ;;  %v246_v2 = vsel %vm244_vm4, %v234_v60, 2102212464 }
  0x7f   : > { %v250_v3 = vsel %vm244_vm4, %v237_v61, 920167782  ;;  %v254_v4 = vsel %vm244_vm4, %v240_v62, 1326507024  ;;  %v247_v5 = vsel %vm243_vm3, %v231_v59, %v246_v2  ;;  %v200_v44 = vmul.f32 -2.0, %v199_v39 }
  0x80   : > { %v251_v6 = vsel %vm243_vm3, %v234_v60, %v250_v3  ;;  %v255_v7 = vsel %vm243_vm3, %v237_v61, %v254_v4  ;;  %v248_v9 = vsel %vm242_vm2, %v245_v63, %v247_v5  ;;  %vm301_vm1 = vweird.f32 %v936_v24 }
  0x81   : > { %v252_v10 = vsel %vm242_vm2, %v249_v0, %v251_v6  ;;  %v256_v11 = vsel %vm242_vm2, %v253_v1, %v255_v7  ;;  %v264_v16 = vmul.u32 %v257_v46, %v248_v9  ;;  %639 = vrsqrt.f32 %v200_v44 }
  0x82   : > { %v942_v12 = vmul.u32.u64.low %v257_v46, %v256_v11  ;;  %v943_v13 = vmul.u32.u64.high %v257_v46, %v256_v11, %v942_v12  ;;  %v945_v14 = vmul.u32.u64.low %v257_v46, %v252_v10  ;;  %v946_v15 = vmul.u32.u64.high %v257_v46, %v252_v10, %v945_v14 }
  0x83   : > { %vm203_vm9 = vcmp.eq.f32.partialorder %v200_v44, inf  ;;  %vm205_vm10 = vcmp.eq.f32.partialorder %v200_v44, 0.0  ;;  %v206_v61 = vand.u32 2147483648, %v200_v44  ;;  %v420_v12 = vld [vmem:[%s929_s17] sm:$0xff] }
  0x84   : > { %vm266_vm5 = vc.u32 %v943_v13, %v945_v14  ;;  %v267_v18 = vadd.s32 1, %v946_v15  ;;  %v265_v33 = vadd.s32 %v945_v14, %v943_v13  ;;  %v421_v13 = vld [vmem:[%s929_s17 + $0x8] sm:$0xff] }
  0x86   : > { %v268_v19 = vsel %vm266_vm5, %v267_v18, %v946_v15 }
  0x87   : > { %v269_v20 = vadd.s32 %v268_v19, %v264_v16 }
  0x89   : > { %v270_v22 = vadd.s32 536870912, %v269_v20 }
  0x8b   : > { %v271_v23 = vshrl.u32 %v270_v22, 30  ;;  %v640_v56 = vpop.eup %639 }
  0x8c   : > { %v202_v59 = vmul.f32 %v640_v56, %v200_v44 }
  0x8d   : > { %v272_v26 = vshll.u32 %v271_v23, 30  ;;  %v295_v48 = vsub.s32 4, %v271_v23 }
  0x8e   : > { %v204_v62 = vsel %vm203_vm9, %v200_v44, %v202_v59 }
  0x8f   : > { %v273_v28 = vsub.s32 %v269_v20, %v272_v26  ;;  %v296_v51 = vsel %vm211_vm7, %v295_v48, %v271_v23  ;;  %v207_v3 = vsel %vm205_vm10, %v206_v61, %v204_v62 }
  0x90   : > { %v298_v54 = vsel %vm210_vm8, 0, %v296_v51 }
  0x91   : > { %v275_v29 = vsub.s32 0, %v273_v28  ;;  %v406_v55 = vadd.s32 3, %v298_v54  ;;  %v302_v57 = vand.u32 3, %v298_v54 }
  0x93   : > { %v544_v30 = vmin.u32 %v275_v29, %v273_v28  ;;  %v407_v58 = vand.u32 3, %v406_v55  ;;  %vm307_vm11 = vcmp.eq.s32.totalorder %v302_v57, 2  ;;  %vm304_vm13 = vcmp.eq.s32.totalorder %v302_v57, 0 }
  0x94   : > { %vm303_vm15 = vcmp.lt.s32.totalorder %v302_v57, 2 }
  0x95   : > { %v277_v31 = vclz %v544_v30  ;;  %vm412_vm12 = vcmp.eq.s32.totalorder %v407_v58, 2  ;;  %vm409_vm14 = vcmp.eq.s32.totalorder %v407_v58, 0  ;;  %vm408_vm0 = vcmp.lt.s32.totalorder %v407_v58, 2 }
  0x97   : > { %v545_v32 = vadd.s32 4294967294, %v277_v31 }
  0x99   : > { %vm546_vm6 = vcmp.lt.s32.totalorder %v545_v32, 0 }
  0x9a   : > { %v280_v35 = vsel %vm546_vm6, 0, %v545_v32 }
  0x9b   : > { %v281_v36 = vsub.s32 32, %v280_v35  ;;  %v282_v37 = vshll.u32 %v273_v28, %v280_v35  ;;  %v285_v38 = vsub.s32 4294967266, %v280_v35 }
  0x9d   : > { %v283_v40 = vshrl.u32 %v265_v33, %v281_v36  ;;  %v286_v41 = vadd.s32 127, %v285_v38 }
  0x9f   : > { %v284_v42 = vor.u32 %v283_v40, %v282_v37  ;;  %v287_v43 = vshll.u32 %v286_v41, 23 }
  0xa1   : > { %v288_v45 = vor.u32 4788187, %v287_v43  ;;  %v291_v46 = vcvt.s32.f32 %v284_v42 }
  0xa3   : > { %v289_v47 = vand.u32 2147483647, %v288_v45 }
  0xa5   : > { %v292_v49 = vmul.f32 %v291_v46, %v289_v47 }
  0xa7   : > { %v293_v50 = vxor.u32 2147483648, %v292_v49 }
  0xa9   : > { %v294_v52 = vsel %vm211_vm7, %v293_v50, %v292_v49 }
  0xaa   : > { %v297_v53 = vsel %vm210_vm8, %v936_v24, %v294_v52 }
  0xab   : > { %641 = vcosq.f32 %v297_v53 }
  0xac   : > { %643 = vsinq.f32 %v297_v53 }
  0xb5   : > { %v642_v60 = vpop.eup %641 }
  0xb6   : > { %v644_v27 = vpop.eup %643  ;;  %v308_v63 = vxor.u32 2147483648, %v642_v60 }
  0xb7   : > { %v305_v0 = vxor.u32 2147483648, %v644_v27 }
  0xb8   : > { %v309_v1 = vsel %vm307_vm11, %v308_v63, %v644_v27  ;;  %v414_v2 = vsel %vm412_vm12, %v308_v63, %v644_v27 }
  0xb9   : > { %v306_v4 = vsel %vm304_vm13, %v642_v60, %v305_v0  ;;  %v411_v5 = vsel %vm409_vm14, %v642_v60, %v305_v0 }
  0xba   : > { %v310_v6 = vsel %vm303_vm15, %v306_v4, %v309_v1  ;;  %v415_v7 = vsel %vm408_vm0, %v411_v5, %v414_v2 }
  0xbb   : > { %v311_v8 = vsel %vm301_vm1, nan, %v310_v6  ;;  %v416_v9 = vsel %vm301_vm1, nan, %v415_v7 }
  0xbc   : > { %v312_v10 = vmul.f32 %v311_v8, %v207_v3  ;;  %v417_v11 = vmul.f32 %v416_v9, %v207_v3 }
  0xbe   : > { %v418_v24 = vmul.f32 0.2, %v312_v10  ;;  %v419_v14 = vmul.f32 0.2, %v417_v11 }
  0xc0   : > { %v422_v15 = vadd.f32 %v420_v12, %v418_v24  ;;  %v423_v16 = vadd.f32 %v421_v13, %v419_v14 }
  0xc2   : > { %v551_v17 = vclamps-f32 %v422_v15, 1.0  ;;  %v552_v18 = vclamps-f32 %v423_v16, 1.0 }
  0xc4   : > { %428 = vst [vmem:[%s157_s30] sm:$0xff] %v551_v17  ;;  %429 = vst [vmem:[%s157_s30 + $0x8] sm:$0xff] %v552_v18 }
  0xc5   : > { %698 = shalt.err (!%p695_p8)
}
  0xc6   : > { %s699_s7 = scalar_lea.hbm %s967_s25, 256  ;;  %s703_s12 = scalar_lea.hbm %s1018_s2, 512 }
  0xc7   : > { %p700_p7 = scmp.ne.s32.totalorder %s967_s25, %s699_s7  ;;  %p704_p1 = scmp.lt.u32.totalorder %s967_s25, %s1018_s2 }
  0xc8   : > { %p705_p4 = scmp.lt.u32.totalorder %s703_s12, %s699_s7  ;;  %p707_p11 = scmp.lt.u32.totalorder %s699_s7, %s967_s25 }
  0xc9   : > { %p701_p10 = pnand %p700_p7, %p1026_p12 }
  0xca   : > { %p706_p6 = por %p705_p4, %p704_p1 }
  0xcb   : > { %p702_p13 = pneg %p701_p10 }
  0xcc   : > { %p708_p0 = por %p707_p11, %p706_p6 }
  0xce   : > { %p709_p3 = pnand %p708_p0, %p702_p13 }
  0xd0   : > { %712 = shalt.err (!%p709_p3)
}
  0xd1   : > { %s782_s11 = smov 128   ;;  %s783_s13 = smov 8  }
  0xd2   : > { %566 = dma.vmem_to_hbm [thread:$0]  (%p1026_p12), %s962_s14, 256, %s967_s25, %s431_s27, %s782_s11, %s782_s11, %s783_s13  }
  0xd3 PF: > { %s461_s30 = sand.u32 1, %s749_s19   ;;  %p1027_p9 = scmp.ne.s32.totalorder %s1023_s5, 0 }
  0xd4   : > { %p1028_p2 = scmp.ge.s32.totalorder %s769_s24, 2  ;;  %s462_s15 = scalar_lea.sflag [#allocation6], %s461_s30 }
  0xd6   : > { %p573_p5 = pnand %p1028_p2, %p1027_p9 }
  0xd8   : > { %744 = dma.done.wait (!%p573_p5), %s462_s15, 256  }
  0xd9   : > { %746 = vsyncadd (!%p573_p5), %s462_s15, 4294967040  ;;  %s22_s24 = sadd.s32 1, %s769_s24   ;;  %s1029_s19 = smov %s753_s20 }
  0xda   : > { %p19_p8 = scmp.ge.s32.totalorder %s22_s24, 4   ;;  %s1030_s20 = smov %s757_s21 }
  0xdb   : > { %s1031_s21 = smov %s867_s4  ;;  %s1032_s22 = smov %s765_s23 }
  0xdc   : > { %s1033_s23 = smov %s1035_s26  ;;  %21 = sbr.rel (!%p19_p8) target bundleno = 18 (0x12), region = 69 }
  0xe3   :  { %467 = vsyncpa [#allocation5], 1 }
  0xe4   :  { %469 = vsyncpa [#allocation5 + $0x1], 1 }
  0xe5   :  { %470 = vsyncpa [#allocation6], 1 }
  0xe6   :  { %472 = vsyncpa [#allocation6 + $0x1], 1 }

</bundles_post_ra>
